<compile_context>
chip_gen: v6e
topology: v6e:2x2x1
jax: 0.10.0
libtpu: 0.0.40
codegen_flags: <defaults>
</compile_context>

<pallas_src>
import functools

import jax
import jax.numpy as jnp
from jax.experimental import pallas as pl
from jax.experimental.pallas import tpu as pltpu


def _round_up(x, m):
    return (x + m - 1) // m * m


def _tpu_defaults():
    """Per-generation (max_tile, vmem_limit_bytes, bf16_elementwise)."""
    try:
        kind = jax.devices()[0].device_kind.lower()
    except Exception:
        kind = ""
    if "v7" in kind:        # 64 MiB VMEM per TC, bf16 VPU/EUP
        return 512, 48 * 1024 * 1024, True
    if "v6" in kind:        # 128 MiB VMEM, bf16 VPU/EUP
        return 1024, 100 * 1024 * 1024, True
    if "v5" in kind:        # 128 MiB VMEM, no bf16 VPU/EUP
        return 1024, 100 * 1024 * 1024, False
    return 512, None, False  # conservative fallback for unknown parts


# ---------------------------------------------------------------------------
# Prologue: fused projection + attention logits for all heads (one node tile).
# ---------------------------------------------------------------------------
def proj_kernel(feat_ref, w_ref, al_ref, ar_ref, ft_ref, el_ref, er_ref):
    # feat_ref: [T, D_in]   f32
    # w_ref   : [D_in, H*F] f32   (all heads fused -> single MXU matmul)
    # al_ref  : [H*F, H]    f32   block-diagonal attn_l  (el = ft @ AL)
    # ar_ref  : [H*F, H]    f32   block-diagonal attn_r  (er = ft @ AR)
    # ft_ref  : [T, H*F]    bf16  (output; MXU operand for aggregation)
    # el_ref  : [T, H]      f32   (output)
    # er_ref  : [T, H]      f32   (output)
    ft = jnp.dot(feat_ref[...], w_ref[...], preferred_element_type=jnp.float32)
    ft_ref[...] = ft.astype(ft_ref.dtype)
    el_ref[...] = jnp.dot(ft, al_ref[...], preferred_element_type=jnp.float32)
    er_ref[...] = jnp.dot(ft, ar_ref[...], preferred_element_type=jnp.float32)


# ---------------------------------------------------------------------------
# Aggregation: tiled over (dst tile v, src tile u); all heads per grid step.
# ---------------------------------------------------------------------------
def agg_kernel(counts_ref, adj_ref, el_ref, er_ref, ft_ref, bias_ref, out_ref,
               *, num_heads, out_feats, negative_slope, attn_dtype):
    # counts_ref: [nV*nU] int32 (SMEM, scalar-prefetched, flat) per-tile nnz
    # adj_ref   : [TV, TU] int8   adj[v, u] != 0 iff edge u -> v
    # el_ref    : [H, TU]  f32    src logits (lane-major)
    # er_ref    : [TV, H]  f32    dst logits
    # ft_ref    : [TU, H*F] bf16  projected src features
    # bias_ref  : [1, H*F] f32
    # out_ref   : [TV, H*F] f32   resident across u -> used directly as the
    #                             accumulator (no VMEM scratch).
    v = pl.program_id(0)
    u = pl.program_id(1)
    n_u = pl.num_programs(1)

    @pl.when(u == 0)
    def _():
        out_ref[...] = jnp.zeros_like(out_ref)

    @pl.when(counts_ref[v * n_u + u] > 0)     # skip all-zero adjacency tiles
    def _():
        # Mask hoisted out of the head loop: one int8 unpack/select per tile.
        maskf = (adj_ref[...] != 0).astype(attn_dtype)       # [TV, TU]
        el = el_ref[...].astype(attn_dtype)                  # [H, TU]
        er = er_ref[...].astype(attn_dtype)                  # [TV, H]
        ft = ft_ref[...]                                     # [TU, H*F] bf16

        for h in range(num_heads):            # static, small H
            # e[v, u] = er[v] + el[u]; LeakyReLU; sigmoid; adjacency mask.
            e = er[:, h:h + 1] + el[h:h + 1, :]              # [TV, TU]
            e = jnp.where(e >= 0, e, negative_slope * e)     # LeakyReLU
            # sigmoid(x) = 0.5 * (1 + tanh(0.5*x)) -> one EUP pass (vs exp+rcp)
            a = (0.5 + 0.5 * jnp.tanh(0.5 * e)) * maskf
            out_ref[:, h * out_feats:(h + 1) * out_feats] += jnp.dot(
                a.astype(jnp.bfloat16),
                ft[:, h * out_feats:(h + 1) * out_feats],
                preferred_element_type=jnp.float32)          # [TV, F] f32

    @pl.when(u == n_u - 1)
    def _():
        out_ref[...] += bias_ref[...]


# ---------------------------------------------------------------------------
# Wrapper
# ---------------------------------------------------------------------------
def gat_conv_forward(feat, adj, w_hdf, attn_l, attn_r, bias,
                     negative_slope=0.2, max_tile=None, vmem_limit_bytes=None,
                     attn_dtype=None):
    """feat: [N, D_in], adj: [N, N] (adj[v,u]!=0 iff u->v), w_hdf: [H, D_in, F],
    attn_l/attn_r: [H, F], bias: [H, F]  ->  [N, H, F]"""
    N, d_in = feat.shape
    H, _, F = w_hdf.shape
    HF = H * F

    dflt_tile, dflt_vmem, dflt_bf16 = _tpu_defaults()
    if max_tile is None:
        max_tile = dflt_tile
    if vmem_limit_bytes is None:
        vmem_limit_bytes = dflt_vmem
    if attn_dtype is None:
        attn_dtype = jnp.bfloat16 if dflt_bf16 else jnp.float32

    # Tile size: one full (128-aligned) tile when N is small, otherwise the
    # per-generation max_tile (512 on v7x, 1024 on v5e/v6e).
    if N <= max_tile:
        T = max(128, _round_up(N, 128))
    else:
        T = _round_up(max_tile, 128)
    Np = _round_up(N, T)
    n_tiles = Np // T

    # int8 BEFORE padding: avoids a second full-f32 O(N^2) HBM pass.
    adj_i8 = (adj != 0).astype(jnp.int8)
    if Np != N:
        adj_i8 = jnp.pad(adj_i8, ((0, Np - N), (0, Np - N)))
        feat_p = jnp.pad(feat, ((0, Np - N), (0, 0))).astype(jnp.float32)
    else:
        feat_p = feat.astype(jnp.float32)

    # W as [D_in, H*F]; block-diagonal attn matrices so the per-head logit
    # reductions become one small matmul each (el = ft @ AL, er = ft @ AR).
    w_flat = jnp.transpose(w_hdf, (1, 0, 2)).reshape(d_in, HF).astype(jnp.float32)
    eye = jnp.eye(H, dtype=jnp.float32)
    al_bd = (attn_l[:, :, None] * eye[:, None, :]).reshape(HF, H).astype(jnp.float32)
    ar_bd = (attn_r[:, :, None] * eye[:, None, :]).reshape(HF, H).astype(jnp.float32)
    bias_flat = bias.reshape(1, HF).astype(jnp.float32)

    # ---- projection + logits (Pallas prologue) ----
    ft_bf, el, er = pl.pallas_call(
        proj_kernel,
        out_shape=(jax.ShapeDtypeStruct((Np, HF), jnp.bfloat16),
                   jax.ShapeDtypeStruct((Np, H), jnp.float32),
                   jax.ShapeDtypeStruct((Np, H), jnp.float32)),
        grid_spec=pltpu.PrefetchScalarGridSpec(
            num_scalar_prefetch=0,
            grid=(n_tiles,),
            in_specs=[
                pl.BlockSpec((T, d_in), lambda i: (i, 0)),     # feat tile
                pl.BlockSpec((d_in, HF), lambda i: (0, 0)),    # fused weights
                pl.BlockSpec((HF, H), lambda i: (0, 0)),       # attn_l blkdiag
                pl.BlockSpec((HF, H), lambda i: (0, 0)),       # attn_r blkdiag
            ],
            out_specs=(
                pl.BlockSpec((T, HF), lambda i: (i, 0)),
                pl.BlockSpec((T, H), lambda i: (i, 0)),
                pl.BlockSpec((T, H), lambda i: (i, 0)),
            )),
        compiler_params=pltpu.CompilerParams(
            dimension_semantics=("parallel",),
            vmem_limit_bytes=vmem_limit_bytes),
    )(feat_p, w_flat, al_bd, ar_bd)

    # src logits laid out lane-major [H, Np] (tiny O(N*H) XLA transpose).
    el_t = el.T

    # Per-(dst_tile, src_tile) nonzero counts: int32 accumulation inside the
    # reduce (no materialized int32 N^2 copy), flattened 1-D for SMEM.
    counts = jnp.sum(adj_i8.reshape(n_tiles, T, n_tiles, T),
                     axis=(1, 3), dtype=jnp.int32).reshape(-1)

    kernel = functools.partial(agg_kernel, num_heads=H, out_feats=F,
                               negative_slope=negative_slope,
                               attn_dtype=attn_dtype)

    out_flat = pl.pallas_call(
        kernel,
        out_shape=jax.ShapeDtypeStruct((Np, HF), jnp.float32),
        grid_spec=pltpu.PrefetchScalarGridSpec(
            num_scalar_prefetch=1,
            grid=(n_tiles, n_tiles),
            in_specs=[
                pl.BlockSpec((T, T), lambda v, u, cnt: (v, u)),    # adj int8
                pl.BlockSpec((H, T), lambda v, u, cnt: (0, u)),    # el^T
                pl.BlockSpec((T, H), lambda v, u, cnt: (v, 0)),    # er
                pl.BlockSpec((T, HF), lambda v, u, cnt: (u, 0)),   # ft bf16
                pl.BlockSpec((1, HF), lambda v, u, cnt: (0, 0)),   # bias
            ],
            out_specs=pl.BlockSpec((T, HF), lambda v, u, cnt: (v, 0))),
        compiler_params=pltpu.CompilerParams(
            dimension_semantics=("parallel", "arbitrary"),
            vmem_limit_bytes=vmem_limit_bytes),
    )(counts, adj_i8, el_t, er, ft_bf, bias_flat)

    # [Np, H*F] -> strip padding -> [N, H, F]  (contiguous reshape, no copy).
    return out_flat[:N].reshape(N, H, F)


def gat_conv_reference(feat, adj, w_hdf, attn_l, attn_r, bias):
    """Plain-JAX f32 reference mirroring the PyTorch forward."""
    ft = jnp.einsum("nd,hdf->nhf", feat, w_hdf)             # [N, H, F]
    el = jnp.sum(ft * attn_l[None], axis=-1)                # [N, H]  (src)
    er = jnp.sum(ft * attn_r[None], axis=-1)                # [N, H]  (dst)
    e = el[None, :, :] + er[:, None, :]                     # [N_dst, N_src, H]
    e = jnp.where(e >= 0, e, 0.2 * e)
    a = jax.nn.sigmoid(e) * (adj[:, :, None] != 0)
    rst = jnp.einsum("vuh,uhf->vhf", a, ft)                 # [N, H, F]
    return rst + bias[None, :, :]


if __name__ == "__main__":
    key = jax.random.PRNGKey(0)
    k_feat, k_w, k_al, k_ar, k_adj = jax.random.split(key, 5)

    # Small shapes consistent with the module.
    N, in_feats, num_heads, out_feats = 200, 16, 4, 8
    gain = jnp.sqrt(2.0)  # calculate_gain('relu')

    feat = jax.random.normal(k_feat, (N, in_feats), dtype=jnp.float32)

    # fc: Linear(in_feats, out_feats*num_heads, bias=False); stored as
    # W [D_in, H*F] and split per head -> [H, D_in, F].
    std_w = gain * jnp.sqrt(2.0 / (in_feats + out_feats * num_heads))
    w = std_w * jax.random.normal(k_w, (in_feats, num_heads * out_feats),
                                  dtype=jnp.float32)
    w_hdf = jnp.transpose(w.reshape(in_feats, num_heads, out_feats), (1, 0, 2))

    std_a = gain * jnp.sqrt(2.0 / (1 + num_heads * out_feats))
    attn_l = std_a * jax.random.normal(k_al, (num_heads, out_feats), jnp.float32)
    attn_r = std_a * jax.random.normal(k_ar, (num_heads, out_feats), jnp.float32)

    # bias initialized to 0 (as in reset_parameters).
    bias = jnp.zeros((num_heads, out_feats), dtype=jnp.float32)

    # Dense adjacency adj[v, u] = 1 iff edge u -> v; self loops so no node has
    # zero in-degree (mirrors the allow_zero_in_degree check).
    adj = (jax.random.uniform(k_adj, (N, N)) < 0.3).astype(jnp.float32)
    adj = jnp.maximum(adj, jnp.eye(N, dtype=jnp.float32))

    # TODO(synk): dropout (feat_drop/attn_drop) omitted — rates are 0.0 / eval.

    ref = gat_conv_reference(feat, adj, w_hdf, attn_l, attn_r, bias)
    scale = jnp.maximum(jnp.max(jnp.abs(ref)), 1.0)

    # 1) default (per-generation) tile size -> single-tile path at this N.
    out = gat_conv_forward(feat, adj, w_hdf, attn_l, attn_r, bias)
    out = jax.block_until_ready(out)
    assert out.shape == (N, num_heads, out_feats)
    max_err = jnp.max(jnp.abs(out - ref))
    assert max_err / scale < 2e-2, f"default-tile mismatch: max err {max_err}"

    # 2) small tile -> exercises the multi-tile accumulate / pad / skip path.
    out2 = gat_conv_forward(feat, adj, w_hdf, attn_l, attn_r, bias,
                            max_tile=128)
    out2 = jax.block_until_ready(out2)
    max_err2 = jnp.max(jnp.abs(out2 - ref))
    assert max_err2 / scale < 2e-2, f"tiled mismatch: max err {max_err2}"

    print("KERNEL_OK")
</pallas_src>

<mosaic_0001>
module attributes {stable_mosaic.version = 11 : i64} {
  func.func @proj_kernel(%arg0: i32, %arg1: memref<256x16xf32, #tpu.memory_space<vmem>>, %arg2: memref<16x32xf32, #tpu.memory_space<vmem>>, %arg3: memref<32x4xf32, #tpu.memory_space<vmem>>, %arg4: memref<32x4xf32, #tpu.memory_space<vmem>>, %arg5: memref<256x32xbf16, #tpu.memory_space<vmem>>, %arg6: memref<256x4xf32, #tpu.memory_space<vmem>>, %arg7: memref<256x4xf32, #tpu.memory_space<vmem>>) attributes {dimension_semantics = [#tpu.dimension_semantics<parallel>], iteration_bounds = array<i64: 1>, scalar_prefetch = 0 : i64, scratch_operands = 0 : i64, tpu.core_type = #tpu.core_type<tc>, window_params = [{transform_indices = @transform_0, window_bounds = array<i64: 256, 16>}, {pipeline_mode = #tpu.pipeline_mode<synchronous>, transform_indices = @transform_1, window_bounds = array<i64: 16, 32>}, {pipeline_mode = #tpu.pipeline_mode<synchronous>, transform_indices = @transform_2, window_bounds = array<i64: 32, 4>}, {pipeline_mode = #tpu.pipeline_mode<synchronous>, transform_indices = @transform_3, window_bounds = array<i64: 32, 4>}, {transform_indices = @transform_4, window_bounds = array<i64: 256, 32>}, {transform_indices = @transform_5, window_bounds = array<i64: 256, 4>}, {transform_indices = @transform_6, window_bounds = array<i64: 256, 4>}]} {
    %c0 = arith.constant 0 : index
    %c0_0 = arith.constant 0 : index
    %0 = vector.load %arg1[%c0, %c0_0] : memref<256x16xf32, #tpu.memory_space<vmem>>, vector<256x16xf32>
    %c0_1 = arith.constant 0 : index
    %c0_2 = arith.constant 0 : index
    %1 = vector.load %arg2[%c0_1, %c0_2] : memref<16x32xf32, #tpu.memory_space<vmem>>, vector<16x32xf32>
    %cst = arith.constant dense<0.000000e+00> : vector<256x32xf32>
    %2 = tpu.matmul %0, %1, %cst {dimension_numbers = #tpu.dot_dimension_numbers<[1], [0], [0], [1], [0, 0, 1, 1], [], []>} : vector<256x16xf32>, vector<16x32xf32>, vector<256x32xf32> -> vector<256x32xf32>
    %3 = arith.truncf %2 : vector<256x32xf32> to vector<256x32xbf16>
    %c0_3 = arith.constant 0 : index
    %c0_4 = arith.constant 0 : index
    %4 = vector.load %arg5[%c0_3, %c0_4] : memref<256x32xbf16, #tpu.memory_space<vmem>>, vector<256x32xbf16>
    tpu.vector_store %arg5[%c0_3, %c0_4], %3 {strides = array<i32>} : memref<256x32xbf16, #tpu.memory_space<vmem>>, vector<256x32xbf16>,
    %c0_5 = arith.constant 0 : index
    %c0_6 = arith.constant 0 : index
    %5 = vector.load %arg3[%c0_5, %c0_6] : memref<32x4xf32, #tpu.memory_space<vmem>>, vector<32x4xf32>
    %cst_7 = arith.constant dense<0.000000e+00> : vector<256x4xf32>
    %6 = tpu.matmul %2, %5, %cst_7 {dimension_numbers = #tpu.dot_dimension_numbers<[1], [0], [0], [1], [0, 0, 1, 1], [], []>} : vector<256x32xf32>, vector<32x4xf32>, vector<256x4xf32> -> vector<256x4xf32>
    %c0_8 = arith.constant 0 : index
    %c0_9 = arith.constant 0 : index
    %7 = vector.load %arg6[%c0_8, %c0_9] : memref<256x4xf32, #tpu.memory_space<vmem>>, vector<256x4xf32>
    tpu.vector_store %arg6[%c0_8, %c0_9], %6 {strides = array<i32>} : memref<256x4xf32, #tpu.memory_space<vmem>>, vector<256x4xf32>,
    %c0_10 = arith.constant 0 : index
    %c0_11 = arith.constant 0 : index
    %8 = vector.load %arg4[%c0_10, %c0_11] : memref<32x4xf32, #tpu.memory_space<vmem>>, vector<32x4xf32>
    %cst_12 = arith.constant dense<0.000000e+00> : vector<256x4xf32>
    %9 = tpu.matmul %2, %8, %cst_12 {dimension_numbers = #tpu.dot_dimension_numbers<[1], [0], [0], [1], [0, 0, 1, 1], [], []>} : vector<256x32xf32>, vector<32x4xf32>, vector<256x4xf32> -> vector<256x4xf32>
    %c0_13 = arith.constant 0 : index
    %c0_14 = arith.constant 0 : index
    %10 = vector.load %arg7[%c0_13, %c0_14] : memref<256x4xf32, #tpu.memory_space<vmem>>, vector<256x4xf32>
    tpu.vector_store %arg7[%c0_13, %c0_14], %9 {strides = array<i32>} : memref<256x4xf32, #tpu.memory_space<vmem>>, vector<256x4xf32>,
    return
  }
  func.func @transform_0(%arg0: i32) -> (i32, i32) {
    %c0_i32 = arith.constant 0 : i32
    %c0_i32_0 = arith.constant 0 : i32
    return %arg0, %c0_i32 : i32, i32
  }
  func.func @transform_1(%arg0: i32) -> (i32, i32) {
    %c0_i32 = arith.constant 0 : i32
    %c0_i32_0 = arith.constant 0 : i32
    %c0_i32_1 = arith.constant 0 : i32
    return %c0_i32, %c0_i32_0 : i32, i32
  }
  func.func @transform_2(%arg0: i32) -> (i32, i32) {
    %c0_i32 = arith.constant 0 : i32
    %c0_i32_0 = arith.constant 0 : i32
    %c0_i32_1 = arith.constant 0 : i32
    return %c0_i32, %c0_i32_0 : i32, i32
  }
  func.func @transform_3(%arg0: i32) -> (i32, i32) {
    %c0_i32 = arith.constant 0 : i32
    %c0_i32_0 = arith.constant 0 : i32
    %c0_i32_1 = arith.constant 0 : i32
    return %c0_i32, %c0_i32_0 : i32, i32
  }
  func.func @transform_4(%arg0: i32) -> (i32, i32) {
    %c0_i32 = arith.constant 0 : i32
    %c0_i32_0 = arith.constant 0 : i32
    return %arg0, %c0_i32 : i32, i32
  }
  func.func @transform_5(%arg0: i32) -> (i32, i32) {
    %c0_i32 = arith.constant 0 : i32
    %c0_i32_0 = arith.constant 0 : i32
    return %arg0, %c0_i32 : i32, i32
  }
  func.func @transform_6(%arg0: i32) -> (i32, i32) {
    %c0_i32 = arith.constant 0 : i32
    %c0_i32_0 = arith.constant 0 : i32
    return %arg0, %c0_i32 : i32, i32
  }
}

</mosaic_0001>

<bundles_post_ra>
// kernel: tpu_custom_call.1
= control target key start
LH: loop header
LB: loop body
LE: loop exit
PB: predicated region body
PF: predicated region fallthrough
CT: control target
= control target key end

     0   :  { %vm54_vm0 = vcmask 130048   ;;  %vm504_vm1 = vcmask 257024   ;;  %vm541_vm2 = vcmask 261120   ;;  %vm863_vm3 = vcmask 31744   ;;  %s2310_s1 = inlined_call_operand.vmem [shape: f32[16,32], index: 1, kind: input, shape index: {}]   ;;  %s2311_s0 = inlined_call_operand.vmem [shape: f32[256,16], index: 0, kind: input, shape index: {}]   ;;  %s2312_s2 = inlined_call_operand.vmem [shape: f32[32,4], index: 2, kind: input, shape index: {}]   ;;  %s2313_s3 = inlined_call_operand.vmem [shape: f32[32,4], index: 3, kind: input, shape index: {}]   ;;  %s2314_s4 = inlined_call_operand.vmem [shape: bf16[256,32], index: 4, kind: output, shape index: {0}]   ;;  %s2315_s5 = inlined_call_operand.vmem [shape: f32[256,4], index: 5, kind: output, shape index: {1}]   ;;  %s2316_s6 = inlined_call_operand.vmem [shape: f32[256,4], index: 6, kind: output, shape index: {2}]  }
   0x1   :  { %v53_v0 = vld [vmem:[%s2310_s1 + $0x8] sm:$0xff]  ;;  %v52_v1 = vld [vmem:[%s2310_s1] sm:$0xff]  ;;  %v22_v4 = vld [vmem:[%s2311_s0 + $0x10] sm:$0xff] }
   0x2   :  { %v20_v2 = vld [vmem:[%s2311_s0] sm:$0xff]  ;;  %1435 = vmatprep.subr.mxu0 %v53_v0  ;;  %v21_v3 = vld [vmem:[%s2311_s0 + $0x8] sm:$0xff]  ;;  %1599 = vmatprep.subr.mxu1 %v53_v0  ;;  %v23_v5 = vld [vmem:[%s2311_s0 + $0x18] sm:$0xff] }
   0x3   :  { %1439 = vmatprep.mubr.msk.f32.mxu0 %vm54_vm0, %v20_v2  ;;  %1436 = vmatpush3.msra.mxu0 %v53_v0  ;;  %v36_v6 = vld [vmem:[%s2311_s0 + $0x80] sm:$0xff]  ;;  %v37_v7 = vld [vmem:[%s2311_s0 + $0x88] sm:$0xff]  ;;  %v38_v8 = vld [vmem:[%s2311_s0 + $0x90] sm:$0xff] }
   0x4   :  { %1437 = vmatprep.subr.mxu0 %v52_v1  ;;  %1601 = vmatpush3.msra.mxu1 %v53_v0  ;;  %v24_v9 = vld [vmem:[%s2311_s0 + $0x20] sm:$0xff]  ;;  %v39_v10 = vld [vmem:[%s2311_s0 + $0x98] sm:$0xff]  ;;  %v25_v11 = vld [vmem:[%s2311_s0 + $0x28] sm:$0xff] }
   0x5   :  { %1438 = vmatpush3.msra.mxu0 %v52_v1  ;;  %1600 = vmatprep.subr.mxu1 %v52_v1  ;;  %v40_v12 = vld [vmem:[%s2311_s0 + $0xa0] sm:$0xff]  ;;  %v26_v13 = vld [vmem:[%s2311_s0 + $0x30] sm:$0xff]  ;;  %v540_v14 = vld [vmem:[%s2312_s2 + $0x18] sm:$0xff] }
   0x6   :  { %1440 = vmatmul.mubr.msk.f32.vlgmr.msra.gmra.mxu0 %vm54_vm0, %v21_v3  ;;  %1602 = vmatpush3.msra.mxu1 %v52_v1  ;;  %v899_v15 = vld [vmem:[%s2313_s3 + $0x18] sm:$0xff]  ;;  %v41_v16 = vld [vmem:[%s2311_s0 + $0xa8] sm:$0xff]  ;;  %v539_v17 = vld [vmem:[%s2312_s2 + $0x10] sm:$0xff] }
   0x7   :  { %1442 = vmatprep.mubr.msk.f32.mxu0 %vm54_vm0, %v22_v4  ;;  %1463 = vmatprep.mubr.msk.f32.mxu1 %vm54_vm0, %v36_v6  ;;  %v27_v18 = vld [vmem:[%s2311_s0 + $0x38] sm:$0xff]  ;;  %v42_v19 = vld [vmem:[%s2311_s0 + $0xb0] sm:$0xff]  ;;  %v28_v20 = vld [vmem:[%s2311_s0 + $0x40] sm:$0xff] }
   0x8   :  { %1464 = vmatmul.mubr.msk.f32.vlgmr.msra.gmra.mxu1 %vm54_vm0, %v37_v7  ;;  %1487 = vmatprep.subr.mxu1 %v540_v14  ;;  %v898_v21 = vld [vmem:[%s2313_s3 + $0x10] sm:$0xff]  ;;  %v43_v22 = vld [vmem:[%s2311_s0 + $0xb8] sm:$0xff]  ;;  %v538_v23 = vld [vmem:[%s2312_s2 + $0x8] sm:$0xff] }
   0x9   :  { %1466 = vmatprep.mubr.msk.f32.mxu1 %vm54_vm0, %v38_v8  ;;  %1543 = vmatprep.subr.mxu0 %v899_v15  ;;  %v29_v24 = vld [vmem:[%s2311_s0 + $0x48] sm:$0xff]  ;;  %v44_v25 = vld [vmem:[%s2311_s0 + $0xc0] sm:$0xff]  ;;  %v30_v26 = vld [vmem:[%s2311_s0 + $0x50] sm:$0xff] }
   0xa   :  { %1443 = vmatmul.mubr.msk.f32.gmra.mxu0 %vm54_vm0, %v23_v5  ;;  %1488 = vmatpush3.msra.mxu1 %v540_v14  ;;  %v897_v27 = vld [vmem:[%s2313_s3 + $0x8] sm:$0xff]  ;;  %v537_v29 = vld [vmem:[%s2312_s2] sm:$0xff]  ;;  %v31_v30 = vld [vmem:[%s2311_s0 + $0x58] sm:$0xff] }
   0xb   :  { %1445 = vmatprep.mubr.msk.f32.mxu0 %vm54_vm0, %v24_v9  ;;  %1544 = vmatpush3.msra.mxu0 %v899_v15  ;;  %v45_v28 = vld [vmem:[%s2311_s0 + $0xc8] sm:$0xff]  ;;  %v46_v31 = vld [vmem:[%s2311_s0 + $0xd0] sm:$0xff]  ;;  %v32_v32 = vld [vmem:[%s2311_s0 + $0x60] sm:$0xff] }
   0xc   :  { %1467 = vmatmul.mubr.msk.f32.gmra.mxu1 %vm54_vm0, %v39_v10  ;;  %1489 = vmatprep.subr.mxu1 %v539_v17  ;;  %v896_v33 = vld [vmem:[%s2313_s3] sm:$0xff]  ;;  %v47_v34 = vld [vmem:[%s2311_s0 + $0xd8] sm:$0xff]  ;;  %v33_v35 = vld [vmem:[%s2311_s0 + $0x68] sm:$0xff] }
   0xd   :  { %1469 = vmatprep.mubr.msk.f32.mxu1 %vm54_vm0, %v40_v12  ;;  %1545 = vmatprep.subr.mxu0 %v898_v21  ;;  %v48_v36 = vld [vmem:[%s2311_s0 + $0xe0] sm:$0xff]  ;;  %v34_v37 = vld [vmem:[%s2311_s0 + $0x70] sm:$0xff]  ;;  %v49_v38 = vld [vmem:[%s2311_s0 + $0xe8] sm:$0xff] }
   0xe   :  { %1446 = vmatmul.mubr.msk.f32.gmra.mxu0 %vm54_vm0, %v25_v11  ;;  %1490 = vmatpush3.msra.mxu1 %v539_v17  ;;  %v35_v39 = vld [vmem:[%s2311_s0 + $0x78] sm:$0xff]  ;;  %v50_v40 = vld [vmem:[%s2311_s0 + $0xf0] sm:$0xff] }
   0xf   :  { %1448 = vmatprep.mubr.msk.f32.mxu0 %vm54_vm0, %v26_v13  ;;  %1546 = vmatpush3.msra.mxu0 %v898_v21  ;;  %v51_v41 = vld [vmem:[%s2311_s0 + $0xf8] sm:$0xff] }
  0x10   :  { %1470 = vmatmul.mubr.msk.f32.gmra.mxu1 %vm54_vm0, %v41_v16  ;;  %1491 = vmatprep.subr.mxu1 %v538_v23 }
  0x11   :  { %1472 = vmatprep.mubr.msk.f32.mxu1 %vm54_vm0, %v42_v19  ;;  %1547 = vmatprep.subr.mxu0 %v897_v27 }
  0x12   :  { %1449 = vmatmul.mubr.msk.f32.gmra.mxu0 %vm54_vm0, %v27_v18  ;;  %1492 = vmatpush3.msra.mxu1 %v538_v23 }
  0x13   :  { %1451 = vmatprep.mubr.msk.f32.mxu0 %vm54_vm0, %v28_v20  ;;  %1548 = vmatpush3.msra.mxu0 %v897_v27 }
  0x14   :  { %1473 = vmatmul.mubr.msk.f32.gmra.mxu1 %vm54_vm0, %v43_v22  ;;  %1493 = vmatprep.subr.mxu1 %v537_v29 }
  0x15   :  { %1475 = vmatprep.mubr.msk.f32.mxu1 %vm54_vm0, %v44_v25  ;;  %1549 = vmatprep.subr.mxu0 %v896_v33 }
  0x16   :  { %1452 = vmatmul.mubr.msk.f32.gmra.mxu0 %vm54_vm0, %v29_v24  ;;  %1494 = vmatpush3.msra.mxu1 %v537_v29 }
  0x17   :  { %1454 = vmatprep.mubr.msk.f32.mxu0 %vm54_vm0, %v30_v26  ;;  %1550 = vmatpush3.msra.mxu0 %v896_v33 }
  0x18   :  { %1476 = vmatmul.mubr.msk.f32.gmra.mxu1 %vm54_vm0, %v45_v28 }
  0x19   :  { %1478 = vmatprep.mubr.msk.f32.mxu1 %vm54_vm0, %v46_v31 }
  0x1a   :  { %1455 = vmatmul.mubr.msk.f32.gmra.mxu0 %vm54_vm0, %v31_v30 }
  0x1b   :  { %1457 = vmatprep.mubr.msk.f32.mxu0 %vm54_vm0, %v32_v32 }
  0x1c   :  { %1479 = vmatmul.mubr.msk.f32.gmra.mxu1 %vm54_vm0, %v47_v34 }
  0x1d   :  { %1481 = vmatprep.mubr.msk.f32.mxu1 %vm54_vm0, %v48_v36 }
  0x1e   :  { %1458 = vmatmul.mubr.msk.f32.gmra.mxu0 %vm54_vm0, %v33_v35 }
  0x1f   :  { %1460 = vmatprep.mubr.msk.f32.mxu0 %vm54_vm0, %v34_v37 }
  0x20   :  { %1482 = vmatmul.mubr.msk.f32.gmra.mxu1 %vm54_vm0, %v49_v38 }
  0x21   :  { %1484 = vmatprep.mubr.msk.f32.mxu1 %vm54_vm0, %v50_v40 }
  0x22   :  { %1461 = vmatmul.mubr.msk.f32.gmra.mxu0 %vm54_vm0, %v35_v39 }
  0x24   :  { %1485 = vmatmul.mubr.msk.f32.gmra.mxu1 %vm54_vm0, %v51_v41 }
  0xc6   :  { %v1441_v42 = vpop.f32.mrf.mxu0 }
  0xc7   :  { %v1298_v43 = vpack.c.bf16 %v1441_v42, %v1441_v42 }
  0xc8   :  { %v217_v44 = vpop.f32.mrf.mxu0  ;;  %v1802_v46 = vpop.f32.mrf.mxu1 }
  0xc9   :  { %506 = vst.msk [vmem:[%s2314_s4 + $0x4] sm:$0xf] %vm504_vm1, %v1298_v43  ;;  %v1297_v45 = vpack.c.bf16 %v217_v44, %v217_v44  ;;  %1495 = vmatprep.mubr.msk.f32.mxu1 %vm541_vm2, %v217_v44  ;;  %1551 = vmatprep.mubr.msk.f32.mxu0 %vm541_vm2, %v217_v44  ;;  %v1314_v48 = vpack.c.bf16 %v1802_v46, %v1802_v46 }
  0xca   :  { %v1444_v47 = vpop.f32.mrf.mxu0  ;;  %1496 = vmatmul.mubr.msk.f32.vlgmr.msra.gmra.mxu1 %vm541_vm2, %v1441_v42  ;;  %1552 = vmatmul.mubr.msk.f32.vlgmr.msra.gmra.mxu0 %vm541_vm2, %v1441_v42  ;;  %v1812_v50 = vpop.f32.mrf.mxu1 }
  0xcb   :  { %505 = vst.msk [vmem:[%s2314_s4] sm:$0xf] %vm504_vm1, %v1297_v45  ;;  %v1300_v49 = vpack.c.bf16 %v1444_v47, %v1444_v47  ;;  %522 = vst.msk [vmem:[%s2314_s4 + $0x44] sm:$0xf] %vm504_vm1, %v1314_v48  ;;  %v1313_v52 = vpack.c.bf16 %v1812_v50, %v1812_v50 }
  0xcc   :  { %v227_v51 = vpop.f32.mrf.mxu0  ;;  %v1826_v54 = vpop.f32.mrf.mxu1 }
  0xcd   :  { %508 = vst.msk [vmem:[%s2314_s4 + $0xc] sm:$0xf] %vm504_vm1, %v1300_v49  ;;  %v1299_v53 = vpack.c.bf16 %v227_v51, %v227_v51  ;;  %1498 = vmatprep.mubr.msk.f32.mxu1 %vm541_vm2, %v227_v51  ;;  %1554 = vmatprep.mubr.msk.f32.mxu0 %vm541_vm2, %v227_v51  ;;  %521 = vst.msk [vmem:[%s2314_s4 + $0x40] sm:$0xf] %vm504_vm1, %v1313_v52  ;;  %v1316_v56 = vpack.c.bf16 %v1826_v54, %v1826_v54 }
  0xce   :  { %v1447_v55 = vpop.f32.mrf.mxu0  ;;  %1499 = vmatmul.mubr.msk.f32.gmra.mxu1 %vm541_vm2, %v1444_v47  ;;  %1555 = vmatmul.mubr.msk.f32.gmra.mxu0 %vm541_vm2, %v1444_v47  ;;  %v1840_v58 = vpop.f32.mrf.mxu1 }
  0xcf   :  { %507 = vst.msk [vmem:[%s2314_s4 + $0x8] sm:$0xf] %vm504_vm1, %v1299_v53  ;;  %v1302_v57 = vpack.c.bf16 %v1447_v55, %v1447_v55  ;;  %524 = vst.msk [vmem:[%s2314_s4 + $0x4c] sm:$0xf] %vm504_vm1, %v1316_v56  ;;  %v1315_v60 = vpack.c.bf16 %v1840_v58, %v1840_v58 }
  0xd0   :  { %v237_v59 = vpop.f32.mrf.mxu0  ;;  %v1854_v62 = vpop.f32.mrf.mxu1 }
  0xd1   :  { %510 = vst.msk [vmem:[%s2314_s4 + $0x14] sm:$0xf] %vm504_vm1, %v1302_v57  ;;  %v1301_v61 = vpack.c.bf16 %v237_v59, %v237_v59  ;;  %1501 = vmatprep.mubr.msk.f32.mxu1 %vm541_vm2, %v237_v59  ;;  %1557 = vmatprep.mubr.msk.f32.mxu0 %vm541_vm2, %v237_v59  ;;  %523 = vst.msk [vmem:[%s2314_s4 + $0x48] sm:$0xf] %vm504_vm1, %v1315_v60  ;;  %v1318_v0 = vpack.c.bf16 %v1854_v62, %v1854_v62 }
  0xd2   :  { %v1450_v63 = vpop.f32.mrf.mxu0  ;;  %1502 = vmatmul.mubr.msk.f32.gmra.mxu1 %vm541_vm2, %v1447_v55  ;;  %1558 = vmatmul.mubr.msk.f32.gmra.mxu0 %vm541_vm2, %v1447_v55  ;;  %v1868_v2 = vpop.f32.mrf.mxu1 }
  0xd3   :  { %509 = vst.msk [vmem:[%s2314_s4 + $0x10] sm:$0xf] %vm504_vm1, %v1301_v61  ;;  %v1304_v1 = vpack.c.bf16 %v1450_v63, %v1450_v63  ;;  %526 = vst.msk [vmem:[%s2314_s4 + $0x54] sm:$0xf] %vm504_vm1, %v1318_v0  ;;  %v1317_v4 = vpack.c.bf16 %v1868_v2, %v1868_v2 }
  0xd4   :  { %v247_v3 = vpop.f32.mrf.mxu0  ;;  %v1882_v6 = vpop.f32.mrf.mxu1 }
  0xd5   :  { %512 = vst.msk [vmem:[%s2314_s4 + $0x1c] sm:$0xf] %vm504_vm1, %v1304_v1  ;;  %v1303_v5 = vpack.c.bf16 %v247_v3, %v247_v3  ;;  %1504 = vmatprep.mubr.msk.f32.mxu1 %vm541_vm2, %v247_v3  ;;  %1560 = vmatprep.mubr.msk.f32.mxu0 %vm541_vm2, %v247_v3  ;;  %525 = vst.msk [vmem:[%s2314_s4 + $0x50] sm:$0xf] %vm504_vm1, %v1317_v4  ;;  %v1320_v8 = vpack.c.bf16 %v1882_v6, %v1882_v6 }
  0xd6   :  { %v1453_v7 = vpop.f32.mrf.mxu0  ;;  %1505 = vmatmul.mubr.msk.f32.gmra.mxu1 %vm541_vm2, %v1450_v63  ;;  %1561 = vmatmul.mubr.msk.f32.gmra.mxu0 %vm541_vm2, %v1450_v63  ;;  %v1896_v10 = vpop.f32.mrf.mxu1 }
  0xd7   :  { %511 = vst.msk [vmem:[%s2314_s4 + $0x18] sm:$0xf] %vm504_vm1, %v1303_v5  ;;  %v1306_v9 = vpack.c.bf16 %v1453_v7, %v1453_v7  ;;  %528 = vst.msk [vmem:[%s2314_s4 + $0x5c] sm:$0xf] %vm504_vm1, %v1320_v8  ;;  %v1319_v12 = vpack.c.bf16 %v1896_v10, %v1896_v10 }
  0xd8   :  { %v257_v11 = vpop.f32.mrf.mxu0  ;;  %v1910_v14 = vpop.f32.mrf.mxu1 }
  0xd9   :  { %514 = vst.msk [vmem:[%s2314_s4 + $0x24] sm:$0xf] %vm504_vm1, %v1306_v9  ;;  %v1305_v13 = vpack.c.bf16 %v257_v11, %v257_v11  ;;  %1507 = vmatprep.mubr.msk.f32.mxu1 %vm541_vm2, %v257_v11  ;;  %1563 = vmatprep.mubr.msk.f32.mxu0 %vm541_vm2, %v257_v11  ;;  %527 = vst.msk [vmem:[%s2314_s4 + $0x58] sm:$0xf] %vm504_vm1, %v1319_v12  ;;  %v1322_v16 = vpack.c.bf16 %v1910_v14, %v1910_v14 }
  0xda   :  { %v1456_v15 = vpop.f32.mrf.mxu0  ;;  %1508 = vmatmul.mubr.msk.f32.gmra.mxu1 %vm541_vm2, %v1453_v7  ;;  %1564 = vmatmul.mubr.msk.f32.gmra.mxu0 %vm541_vm2, %v1453_v7  ;;  %v1924_v18 = vpop.f32.mrf.mxu1 }
  0xdb   :  { %513 = vst.msk [vmem:[%s2314_s4 + $0x20] sm:$0xf] %vm504_vm1, %v1305_v13  ;;  %v1308_v17 = vpack.c.bf16 %v1456_v15, %v1456_v15  ;;  %530 = vst.msk [vmem:[%s2314_s4 + $0x64] sm:$0xf] %vm504_vm1, %v1322_v16  ;;  %v1321_v20 = vpack.c.bf16 %v1924_v18, %v1924_v18 }
  0xdc   :  { %v267_v19 = vpop.f32.mrf.mxu0  ;;  %v1938_v22 = vpop.f32.mrf.mxu1 }
  0xdd   :  { %516 = vst.msk [vmem:[%s2314_s4 + $0x2c] sm:$0xf] %vm504_vm1, %v1308_v17  ;;  %v1307_v21 = vpack.c.bf16 %v267_v19, %v267_v19  ;;  %1510 = vmatprep.mubr.msk.f32.mxu1 %vm541_vm2, %v267_v19  ;;  %1566 = vmatprep.mubr.msk.f32.mxu0 %vm541_vm2, %v267_v19  ;;  %529 = vst.msk [vmem:[%s2314_s4 + $0x60] sm:$0xf] %vm504_vm1, %v1321_v20  ;;  %v1324_v24 = vpack.c.bf16 %v1938_v22, %v1938_v22 }
  0xde   :  { %v1459_v23 = vpop.f32.mrf.mxu0  ;;  %1511 = vmatmul.mubr.msk.f32.gmra.mxu1 %vm541_vm2, %v1456_v15  ;;  %1567 = vmatmul.mubr.msk.f32.gmra.mxu0 %vm541_vm2, %v1456_v15  ;;  %v347_v26 = vpop.f32.mrf.mxu1 }
  0xdf   :  { %515 = vst.msk [vmem:[%s2314_s4 + $0x28] sm:$0xf] %vm504_vm1, %v1307_v21  ;;  %v1310_v25 = vpack.c.bf16 %v1459_v23, %v1459_v23  ;;  %532 = vst.msk [vmem:[%s2314_s4 + $0x6c] sm:$0xf] %vm504_vm1, %v1324_v24  ;;  %v1323_v28 = vpack.c.bf16 %v347_v26, %v347_v26 }
  0xe0   :  { %v277_v27 = vpop.f32.mrf.mxu0  ;;  %v1483_v30 = vpop.f32.mrf.mxu1 }
  0xe1   :  { %518 = vst.msk [vmem:[%s2314_s4 + $0x34] sm:$0xf] %vm504_vm1, %v1310_v25  ;;  %v1309_v29 = vpack.c.bf16 %v277_v27, %v277_v27  ;;  %1513 = vmatprep.mubr.msk.f32.mxu1 %vm541_vm2, %v277_v27  ;;  %1569 = vmatprep.mubr.msk.f32.mxu0 %vm541_vm2, %v277_v27  ;;  %531 = vst.msk [vmem:[%s2314_s4 + $0x68] sm:$0xf] %vm504_vm1, %v1323_v28  ;;  %v1326_v32 = vpack.c.bf16 %v1483_v30, %v1483_v30 }
  0xe2   :  { %v1462_v31 = vpop.f32.mrf.mxu0  ;;  %1514 = vmatmul.mubr.msk.f32.gmra.mxu1 %vm541_vm2, %v1459_v23  ;;  %1570 = vmatmul.mubr.msk.f32.gmra.mxu0 %vm541_vm2, %v1459_v23  ;;  %v357_v34 = vpop.f32.mrf.mxu1 }
  0xe3   :  { %517 = vst.msk [vmem:[%s2314_s4 + $0x30] sm:$0xf] %vm504_vm1, %v1309_v29  ;;  %v1312_v33 = vpack.c.bf16 %v1462_v31, %v1462_v31  ;;  %534 = vst.msk [vmem:[%s2314_s4 + $0x74] sm:$0xf] %vm504_vm1, %v1326_v32  ;;  %v1325_v36 = vpack.c.bf16 %v357_v34, %v357_v34 }
  0xe4   :  { %v287_v35 = vpop.f32.mrf.mxu0  ;;  %v1486_v38 = vpop.f32.mrf.mxu1 }
  0xe5   :  { %520 = vst.msk [vmem:[%s2314_s4 + $0x3c] sm:$0xf] %vm504_vm1, %v1312_v33  ;;  %v1311_v37 = vpack.c.bf16 %v287_v35, %v287_v35  ;;  %1516 = vmatprep.mubr.msk.f32.mxu1 %vm541_vm2, %v287_v35  ;;  %1572 = vmatprep.mubr.msk.f32.mxu0 %vm541_vm2, %v287_v35  ;;  %533 = vst.msk [vmem:[%s2314_s4 + $0x70] sm:$0xf] %vm504_vm1, %v1325_v36  ;;  %v1328_v39 = vpack.c.bf16 %v1486_v38, %v1486_v38 }
  0xe6   :  { %1517 = vmatmul.mubr.msk.f32.gmra.mxu1 %vm541_vm2, %v1462_v31  ;;  %1573 = vmatmul.mubr.msk.f32.gmra.mxu0 %vm541_vm2, %v1462_v31  ;;  %v367_v40 = vpop.f32.mrf.mxu1 }
  0xe7   :  { %519 = vst.msk [vmem:[%s2314_s4 + $0x38] sm:$0xf] %vm504_vm1, %v1311_v37  ;;  %1519 = vmatprep.mubr.msk.f32.mxu1 %vm541_vm2, %v1812_v50  ;;  %1575 = vmatprep.mubr.msk.f32.mxu0 %vm541_vm2, %v1812_v50  ;;  %536 = vst.msk [vmem:[%s2314_s4 + $0x7c] sm:$0xf] %vm504_vm1, %v1328_v39  ;;  %v1327_v41 = vpack.c.bf16 %v367_v40, %v367_v40 }
  0xe9   :  { %535 = vst.msk [vmem:[%s2314_s4 + $0x78] sm:$0xf] %vm504_vm1, %v1327_v41 }
  0xea   :  { %1520 = vmatmul.mubr.msk.f32.gmra.mxu1 %vm541_vm2, %v1802_v46  ;;  %1576 = vmatmul.mubr.msk.f32.gmra.mxu0 %vm541_vm2, %v1802_v46 }
  0xeb   :  { %1522 = vmatprep.mubr.msk.f32.mxu1 %vm541_vm2, %v1840_v58  ;;  %1578 = vmatprep.mubr.msk.f32.mxu0 %vm541_vm2, %v1840_v58 }
  0xee   :  { %1523 = vmatmul.mubr.msk.f32.gmra.mxu1 %vm541_vm2, %v1826_v54  ;;  %1579 = vmatmul.mubr.msk.f32.gmra.mxu0 %vm541_vm2, %v1826_v54 }
  0xef   :  { %1525 = vmatprep.mubr.msk.f32.mxu1 %vm541_vm2, %v1868_v2  ;;  %1581 = vmatprep.mubr.msk.f32.mxu0 %vm541_vm2, %v1868_v2 }
  0xf2   :  { %1526 = vmatmul.mubr.msk.f32.gmra.mxu1 %vm541_vm2, %v1854_v62  ;;  %1582 = vmatmul.mubr.msk.f32.gmra.mxu0 %vm541_vm2, %v1854_v62 }
  0xf3   :  { %1528 = vmatprep.mubr.msk.f32.mxu1 %vm541_vm2, %v1896_v10  ;;  %1584 = vmatprep.mubr.msk.f32.mxu0 %vm541_vm2, %v1896_v10 }
  0xf6   :  { %1529 = vmatmul.mubr.msk.f32.gmra.mxu1 %vm541_vm2, %v1882_v6  ;;  %1585 = vmatmul.mubr.msk.f32.gmra.mxu0 %vm541_vm2, %v1882_v6 }
  0xf7   :  { %1531 = vmatprep.mubr.msk.f32.mxu1 %vm541_vm2, %v1924_v18  ;;  %1587 = vmatprep.mubr.msk.f32.mxu0 %vm541_vm2, %v1924_v18 }
  0xfa   :  { %1532 = vmatmul.mubr.msk.f32.gmra.mxu1 %vm541_vm2, %v1910_v14  ;;  %1588 = vmatmul.mubr.msk.f32.gmra.mxu0 %vm541_vm2, %v1910_v14 }
  0xfb   :  { %1534 = vmatprep.mubr.msk.f32.mxu1 %vm541_vm2, %v347_v26  ;;  %1590 = vmatprep.mubr.msk.f32.mxu0 %vm541_vm2, %v347_v26 }
  0xfe   :  { %1535 = vmatmul.mubr.msk.f32.gmra.mxu1 %vm541_vm2, %v1938_v22  ;;  %1591 = vmatmul.mubr.msk.f32.gmra.mxu0 %vm541_vm2, %v1938_v22 }
  0xff   :  { %1537 = vmatprep.mubr.msk.f32.mxu1 %vm541_vm2, %v357_v34  ;;  %1593 = vmatprep.mubr.msk.f32.mxu0 %vm541_vm2, %v357_v34 }
 0x102   :  { %1538 = vmatmul.mubr.msk.f32.gmra.mxu1 %vm541_vm2, %v1483_v30  ;;  %1594 = vmatmul.mubr.msk.f32.gmra.mxu0 %vm541_vm2, %v1483_v30 }
 0x103   :  { %1540 = vmatprep.mubr.msk.f32.mxu1 %vm541_vm2, %v367_v40  ;;  %1596 = vmatprep.mubr.msk.f32.mxu0 %vm541_vm2, %v367_v40 }
 0x106   :  { %1541 = vmatmul.mubr.msk.f32.gmra.mxu1 %vm541_vm2, %v1486_v38  ;;  %1597 = vmatmul.mubr.msk.f32.gmra.mxu0 %vm541_vm2, %v1486_v38 }
 0x18a   :  { %v1497_v42 = vpop.f32.mrf.mxu1  ;;  %v1553_v43 = vpop.f32.mrf.mxu0 }
 0x18b   :  { %865 = vst.msk [vmem:[%s2315_s5 + $0x8] sm:$0xff] %vm863_vm3, %v1497_v42  ;;  %1126 = vst.msk [vmem:[%s2316_s6 + $0x8] sm:$0xff] %vm863_vm3, %v1553_v43 }
 0x18c   :  { %v704_v44 = vpop.f32.mrf.mxu1  ;;  %v966_v45 = vpop.f32.mrf.mxu0 }
 0x18d   :  { %864 = vst.msk [vmem:[%s2315_s5] sm:$0xff] %vm863_vm3, %v704_v44  ;;  %1125 = vst.msk [vmem:[%s2316_s6] sm:$0xff] %vm863_vm3, %v966_v45 }
 0x18e   :  { %v1500_v46 = vpop.f32.mrf.mxu1  ;;  %v1556_v47 = vpop.f32.mrf.mxu0 }
 0x18f   :  { %867 = vst.msk [vmem:[%s2315_s5 + $0x18] sm:$0xff] %vm863_vm3, %v1500_v46  ;;  %1128 = vst.msk [vmem:[%s2316_s6 + $0x18] sm:$0xff] %vm863_vm3, %v1556_v47 }
 0x190   :  { %v714_v48 = vpop.f32.mrf.mxu1  ;;  %v976_v49 = vpop.f32.mrf.mxu0 }
 0x191   :  { %866 = vst.msk [vmem:[%s2315_s5 + $0x10] sm:$0xff] %vm863_vm3, %v714_v48  ;;  %1127 = vst.msk [vmem:[%s2316_s6 + $0x10] sm:$0xff] %vm863_vm3, %v976_v49 }
 0x192   :  { %v1503_v50 = vpop.f32.mrf.mxu1  ;;  %v1559_v51 = vpop.f32.mrf.mxu0 }
 0x193   :  { %869 = vst.msk [vmem:[%s2315_s5 + $0x28] sm:$0xff] %vm863_vm3, %v1503_v50  ;;  %1130 = vst.msk [vmem:[%s2316_s6 + $0x28] sm:$0xff] %vm863_vm3, %v1559_v51 }
 0x194   :  { %v724_v52 = vpop.f32.mrf.mxu1  ;;  %v986_v53 = vpop.f32.mrf.mxu0 }
 0x195   :  { %868 = vst.msk [vmem:[%s2315_s5 + $0x20] sm:$0xff] %vm863_vm3, %v724_v52  ;;  %1129 = vst.msk [vmem:[%s2316_s6 + $0x20] sm:$0xff] %vm863_vm3, %v986_v53 }
 0x196   :  { %v1506_v54 = vpop.f32.mrf.mxu1  ;;  %v1562_v55 = vpop.f32.mrf.mxu0 }
 0x197   :  { %871 = vst.msk [vmem:[%s2315_s5 + $0x38] sm:$0xff] %vm863_vm3, %v1506_v54  ;;  %1132 = vst.msk [vmem:[%s2316_s6 + $0x38] sm:$0xff] %vm863_vm3, %v1562_v55 }
 0x198   :  { %v734_v56 = vpop.f32.mrf.mxu1  ;;  %v996_v57 = vpop.f32.mrf.mxu0 }
 0x199   :  { %870 = vst.msk [vmem:[%s2315_s5 + $0x30] sm:$0xff] %vm863_vm3, %v734_v56  ;;  %1131 = vst.msk [vmem:[%s2316_s6 + $0x30] sm:$0xff] %vm863_vm3, %v996_v57 }
 0x19a   :  { %v1509_v58 = vpop.f32.mrf.mxu1  ;;  %v1565_v59 = vpop.f32.mrf.mxu0 }
 0x19b   :  { %873 = vst.msk [vmem:[%s2315_s5 + $0x48] sm:$0xff] %vm863_vm3, %v1509_v58  ;;  %1134 = vst.msk [vmem:[%s2316_s6 + $0x48] sm:$0xff] %vm863_vm3, %v1565_v59 }
 0x19c   :  { %v744_v60 = vpop.f32.mrf.mxu1  ;;  %v1006_v61 = vpop.f32.mrf.mxu0 }
 0x19d   :  { %872 = vst.msk [vmem:[%s2315_s5 + $0x40] sm:$0xff] %vm863_vm3, %v744_v60  ;;  %1133 = vst.msk [vmem:[%s2316_s6 + $0x40] sm:$0xff] %vm863_vm3, %v1006_v61 }
 0x19e   :  { %v1512_v62 = vpop.f32.mrf.mxu1  ;;  %v1568_v63 = vpop.f32.mrf.mxu0 }
 0x19f   :  { %875 = vst.msk [vmem:[%s2315_s5 + $0x58] sm:$0xff] %vm863_vm3, %v1512_v62  ;;  %1136 = vst.msk [vmem:[%s2316_s6 + $0x58] sm:$0xff] %vm863_vm3, %v1568_v63 }
 0x1a0   :  { %v754_v0 = vpop.f32.mrf.mxu1  ;;  %v1016_v1 = vpop.f32.mrf.mxu0 }
 0x1a1   :  { %874 = vst.msk [vmem:[%s2315_s5 + $0x50] sm:$0xff] %vm863_vm3, %v754_v0  ;;  %1135 = vst.msk [vmem:[%s2316_s6 + $0x50] sm:$0xff] %vm863_vm3, %v1016_v1 }
 0x1a2   :  { %v1515_v2 = vpop.f32.mrf.mxu1  ;;  %v1571_v3 = vpop.f32.mrf.mxu0 }
 0x1a3   :  { %877 = vst.msk [vmem:[%s2315_s5 + $0x68] sm:$0xff] %vm863_vm3, %v1515_v2  ;;  %1138 = vst.msk [vmem:[%s2316_s6 + $0x68] sm:$0xff] %vm863_vm3, %v1571_v3 }
 0x1a4   :  { %v764_v4 = vpop.f32.mrf.mxu1  ;;  %v1026_v5 = vpop.f32.mrf.mxu0 }
 0x1a5   :  { %876 = vst.msk [vmem:[%s2315_s5 + $0x60] sm:$0xff] %vm863_vm3, %v764_v4  ;;  %1137 = vst.msk [vmem:[%s2316_s6 + $0x60] sm:$0xff] %vm863_vm3, %v1026_v5 }
 0x1a6   :  { %v1518_v6 = vpop.f32.mrf.mxu1  ;;  %v1574_v7 = vpop.f32.mrf.mxu0 }
 0x1a7   :  { %879 = vst.msk [vmem:[%s2315_s5 + $0x78] sm:$0xff] %vm863_vm3, %v1518_v6  ;;  %1140 = vst.msk [vmem:[%s2316_s6 + $0x78] sm:$0xff] %vm863_vm3, %v1574_v7 }
 0x1a8   :  { %v774_v8 = vpop.f32.mrf.mxu1  ;;  %v1036_v9 = vpop.f32.mrf.mxu0 }
 0x1a9   :  { %878 = vst.msk [vmem:[%s2315_s5 + $0x70] sm:$0xff] %vm863_vm3, %v774_v8  ;;  %1139 = vst.msk [vmem:[%s2316_s6 + $0x70] sm:$0xff] %vm863_vm3, %v1036_v9 }
 0x1aa   :  { %v1521_v10 = vpop.f32.mrf.mxu1  ;;  %v1577_v11 = vpop.f32.mrf.mxu0 }
 0x1ab   :  { %881 = vst.msk [vmem:[%s2315_s5 + $0x88] sm:$0xff] %vm863_vm3, %v1521_v10  ;;  %1142 = vst.msk [vmem:[%s2316_s6 + $0x88] sm:$0xff] %vm863_vm3, %v1577_v11 }
 0x1ac   :  { %v784_v12 = vpop.f32.mrf.mxu1  ;;  %v1046_v13 = vpop.f32.mrf.mxu0 }
 0x1ad   :  { %880 = vst.msk [vmem:[%s2315_s5 + $0x80] sm:$0xff] %vm863_vm3, %v784_v12  ;;  %1141 = vst.msk [vmem:[%s2316_s6 + $0x80] sm:$0xff] %vm863_vm3, %v1046_v13 }
 0x1ae   :  { %v1524_v14 = vpop.f32.mrf.mxu1  ;;  %v1580_v15 = vpop.f32.mrf.mxu0 }
 0x1af   :  { %883 = vst.msk [vmem:[%s2315_s5 + $0x98] sm:$0xff] %vm863_vm3, %v1524_v14  ;;  %1144 = vst.msk [vmem:[%s2316_s6 + $0x98] sm:$0xff] %vm863_vm3, %v1580_v15 }
 0x1b0   :  { %v794_v16 = vpop.f32.mrf.mxu1  ;;  %v1056_v17 = vpop.f32.mrf.mxu0 }
 0x1b1   :  { %882 = vst.msk [vmem:[%s2315_s5 + $0x90] sm:$0xff] %vm863_vm3, %v794_v16  ;;  %1143 = vst.msk [vmem:[%s2316_s6 + $0x90] sm:$0xff] %vm863_vm3, %v1056_v17 }
 0x1b2   :  { %v1527_v18 = vpop.f32.mrf.mxu1  ;;  %v1583_v19 = vpop.f32.mrf.mxu0 }
 0x1b3   :  { %885 = vst.msk [vmem:[%s2315_s5 + $0xa8] sm:$0xff] %vm863_vm3, %v1527_v18  ;;  %1146 = vst.msk [vmem:[%s2316_s6 + $0xa8] sm:$0xff] %vm863_vm3, %v1583_v19 }
 0x1b4   :  { %v804_v20 = vpop.f32.mrf.mxu1  ;;  %v1066_v21 = vpop.f32.mrf.mxu0 }
 0x1b5   :  { %884 = vst.msk [vmem:[%s2315_s5 + $0xa0] sm:$0xff] %vm863_vm3, %v804_v20  ;;  %1145 = vst.msk [vmem:[%s2316_s6 + $0xa0] sm:$0xff] %vm863_vm3, %v1066_v21 }
 0x1b6   :  { %v1530_v22 = vpop.f32.mrf.mxu1  ;;  %v1586_v23 = vpop.f32.mrf.mxu0 }
 0x1b7   :  { %887 = vst.msk [vmem:[%s2315_s5 + $0xb8] sm:$0xff] %vm863_vm3, %v1530_v22  ;;  %1148 = vst.msk [vmem:[%s2316_s6 + $0xb8] sm:$0xff] %vm863_vm3, %v1586_v23 }
 0x1b8   :  { %v814_v24 = vpop.f32.mrf.mxu1  ;;  %v1076_v25 = vpop.f32.mrf.mxu0 }
 0x1b9   :  { %886 = vst.msk [vmem:[%s2315_s5 + $0xb0] sm:$0xff] %vm863_vm3, %v814_v24  ;;  %1147 = vst.msk [vmem:[%s2316_s6 + $0xb0] sm:$0xff] %vm863_vm3, %v1076_v25 }
 0x1ba   :  { %v1533_v26 = vpop.f32.mrf.mxu1  ;;  %v1589_v27 = vpop.f32.mrf.mxu0 }
 0x1bb   :  { %889 = vst.msk [vmem:[%s2315_s5 + $0xc8] sm:$0xff] %vm863_vm3, %v1533_v26  ;;  %1150 = vst.msk [vmem:[%s2316_s6 + $0xc8] sm:$0xff] %vm863_vm3, %v1589_v27 }
 0x1bc   :  { %v824_v28 = vpop.f32.mrf.mxu1  ;;  %v1086_v29 = vpop.f32.mrf.mxu0 }
 0x1bd   :  { %888 = vst.msk [vmem:[%s2315_s5 + $0xc0] sm:$0xff] %vm863_vm3, %v824_v28  ;;  %1149 = vst.msk [vmem:[%s2316_s6 + $0xc0] sm:$0xff] %vm863_vm3, %v1086_v29 }
 0x1be   :  { %v1536_v30 = vpop.f32.mrf.mxu1  ;;  %v1592_v31 = vpop.f32.mrf.mxu0 }
 0x1bf   :  { %891 = vst.msk [vmem:[%s2315_s5 + $0xd8] sm:$0xff] %vm863_vm3, %v1536_v30  ;;  %1152 = vst.msk [vmem:[%s2316_s6 + $0xd8] sm:$0xff] %vm863_vm3, %v1592_v31 }
 0x1c0   :  { %v834_v32 = vpop.f32.mrf.mxu1  ;;  %v1096_v33 = vpop.f32.mrf.mxu0 }
 0x1c1   :  { %890 = vst.msk [vmem:[%s2315_s5 + $0xd0] sm:$0xff] %vm863_vm3, %v834_v32  ;;  %1151 = vst.msk [vmem:[%s2316_s6 + $0xd0] sm:$0xff] %vm863_vm3, %v1096_v33 }
 0x1c2   :  { %v1539_v34 = vpop.f32.mrf.mxu1  ;;  %v1595_v35 = vpop.f32.mrf.mxu0 }
 0x1c3   :  { %893 = vst.msk [vmem:[%s2315_s5 + $0xe8] sm:$0xff] %vm863_vm3, %v1539_v34  ;;  %1154 = vst.msk [vmem:[%s2316_s6 + $0xe8] sm:$0xff] %vm863_vm3, %v1595_v35 }
 0x1c4   :  { %v844_v36 = vpop.f32.mrf.mxu1  ;;  %v1106_v37 = vpop.f32.mrf.mxu0 }
 0x1c5   :  { %892 = vst.msk [vmem:[%s2315_s5 + $0xe0] sm:$0xff] %vm863_vm3, %v844_v36  ;;  %1153 = vst.msk [vmem:[%s2316_s6 + $0xe0] sm:$0xff] %vm863_vm3, %v1106_v37 }
 0x1c6   :  { %v1542_v38 = vpop.f32.mrf.mxu1  ;;  %v1598_v39 = vpop.f32.mrf.mxu0 }
 0x1c7   :  { %895 = vst.msk [vmem:[%s2315_s5 + $0xf8] sm:$0xff] %vm863_vm3, %v1542_v38  ;;  %1156 = vst.msk [vmem:[%s2316_s6 + $0xf8] sm:$0xff] %vm863_vm3, %v1598_v39 }
 0x1c8   :  { %v854_v40 = vpop.f32.mrf.mxu1  ;;  %v1116_v41 = vpop.f32.mrf.mxu0 }
 0x1c9   :  { %894 = vst.msk [vmem:[%s2315_s5 + $0xf0] sm:$0xff] %vm863_vm3, %v854_v40  ;;  %1155 = vst.msk [vmem:[%s2316_s6 + $0xf0] sm:$0xff] %vm863_vm3, %v1116_v41 }

</bundles_post_ra>
